<compile_context>
chip_gen: v6e
topology: v6e:2x2x1
jax: 0.10.0
libtpu: 0.0.40
codegen_flags: <defaults>
</compile_context>

<pallas_src>
import jax
import jax.numpy as jnp
from jax.experimental import pallas as pl
from jax.experimental.pallas import tpu as pltpu

EPS = 1e-6


# --------------------------------------------------------------------------- #
# Kernel
# --------------------------------------------------------------------------- #
def _make_kernel(tn, nj):
    """Build the fused LN -> Linear -> residual kernel for a given column tiling."""

    def kernel(x_ref, alpha_ref, beta_ref, w_ref, b_ref, o_ref, normed_ref):
        # x_ref:      (TR, F)   row tile (block index constant across j -> no re-DMA)
        # alpha_ref:  (1, F)    LayerNorm scale   (VMEM resident)
        # beta_ref:   (1, F)    LayerNorm bias    (VMEM resident)
        # w_ref:      (F, TN)   sublayer Linear weight column tile, layout (in, out)
        # b_ref:      (1, TN)   sublayer Linear bias column tile
        # o_ref:      (TR, TN)  output tile
        # normed_ref: (TR, F)   scratch holding LayerNorm(x) for the current row tile
        j = pl.program_id(1)

        # Compute LayerNorm once per row tile (first column step), reuse afterwards.
        @pl.when(j == 0)
        def _():
            x = x_ref[...]
            f = x.shape[-1]
            mean = jnp.mean(x, axis=-1, keepdims=True)
            centered = x - mean
            # torch semantics: unbiased variance (ddof=1), eps added to the std.
            var = jnp.sum(centered * centered, axis=-1, keepdims=True) * (1.0 / (f - 1))
            denom = jnp.sqrt(var) + EPS
            # EUP approx reciprocal + one Newton-Raphson step: bulk of the divide
            # moves off the VALU while keeping ~f32 accuracy.
            inv = pl.reciprocal(denom, approx=True)
            inv = inv * (2.0 - denom * inv)
            normed_ref[...] = alpha_ref[...] * (centered * inv) + beta_ref[...]

        # sublayer: Linear(features, features) column tile on the MXU (f32 accumulate).
        sub = jnp.dot(normed_ref[...], w_ref[...],
                      preferred_element_type=jnp.float32) + b_ref[...]

        # dropout in eval mode == identity; residual add against the matching
        # columns of the x row tile.
        if nj == 1:
            xs = x_ref[...]
        else:
            # TN is a 128-multiple divisor of F (enforced by the tile chooser), so
            # this static-size slice is always in bounds and lane-aligned.
            col0 = pl.multiple_of(j * tn, tn)
            xs = x_ref[:, pl.ds(col0, tn)]
        o_ref[...] = xs + sub

    return kernel


# --------------------------------------------------------------------------- #
# Tiling heuristics (generation-aware)
# --------------------------------------------------------------------------- #
def _vmem_capacity_bytes():
    """Physical VMEM per TensorCore for the current chip; conservative fallback."""
    try:
        info = pltpu.get_tpu_info()
        cap = getattr(info, "vmem_capacity_bytes", None)
        if cap:
            return int(cap)
    except Exception:
        pass
    return 64 << 20  # v7x per-core size: safe lower bound for all generations


def _choose_tiles(rows, feat, budget):
    """Pick (TR, TN) so that all double-buffered blocks + the LN scratch fit `budget`.

    TN: either the full F (weight column block resident across the row loop), or a
        128-multiple divisor of F whose double-buffered (F, TN) block uses <= 1/3 of
        the budget (no partial column blocks -> no OOB residual slice).
    TR: largest row tile fitting the remaining budget; 256-aligned (v6e/v7x MXU) when
        possible, 128/8-aligned otherwise, capped at 1024 (DMA-efficiency plateau).
    """
    itemsize = 4  # float32

    # ---- TN (weight / output column tile) ----
    w_cap = budget // 3
    if 2 * feat * feat * itemsize <= w_cap:
        tn = feat
    else:
        max_tn = max(128, ((w_cap // (2 * feat * itemsize)) // 128) * 128)
        start = (min(max_tn, feat) // 128) * 128
        tn = feat  # fallback: weight stays resident (only for odd, non-128-aligned F)
        for cand in range(start, 127, -128):
            if feat % cand == 0:
                tn = cand
                break

    # ---- TR (row tile) ----
    # Resident / double-buffered small operands: w (2x), alpha+beta (counted 2x to be
    # safe), bias tile (2x).
    resident = 2 * feat * tn * itemsize + 4 * feat * itemsize + 2 * tn * itemsize
    avail = max(budget - resident, 1 << 20)
    per_row = (3 * feat + 2 * tn) * itemsize  # LN scratch + x (2x) + out (2x)
    tr = int(avail // per_row)
    if tr >= rows:
        tr = rows
    else:
        tr = max(tr, 8)
        if tr >= 256:
            tr = min((tr // 256) * 256, 1024)   # 256-aligned for v6e/v7x MXU
        elif tr >= 128:
            tr = (tr // 128) * 128
        else:
            tr = max((tr // 8) * 8, 8)
        tr = min(tr, rows)
    return tr, tn


# --------------------------------------------------------------------------- #
# Wrapper
# --------------------------------------------------------------------------- #
def residual_connection(x, alpha, beta, w, b):
    """x: (B, S, F) float32 -> (B, S, F) float32."""
    bsz, seq, feat = x.shape
    rows = bsz * seq
    x2d = x.reshape(rows, feat)
    alpha2d = alpha.reshape(1, feat)
    beta2d = beta.reshape(1, feat)
    b2d = b.reshape(1, feat)

    vmem_cap = _vmem_capacity_bytes()
    tile_budget = int(vmem_cap * 0.55)          # leave headroom for compiler scratch
    vmem_limit = int(vmem_cap * 0.75)

    tr, tn = _choose_tiles(rows, feat, tile_budget)
    ni = pl.cdiv(rows, tr)
    nj = pl.cdiv(feat, tn)
    grid = (ni, nj)

    cost = pl.CostEstimate(
        flops=2 * rows * feat * feat + 10 * rows * feat,
        bytes_accessed=2 * rows * feat * 4 + ni * feat * feat * 4 + 3 * feat * 4,
        transcendentals=rows,
    )

    out2d = pl.pallas_call(
        _make_kernel(tn, nj),
        out_shape=jax.ShapeDtypeStruct((rows, feat), jnp.float32),
        grid=grid,
        in_specs=[
            pl.BlockSpec((tr, feat), lambda i, j: (i, 0)),   # x: tiled over rows, const over j
            pl.BlockSpec((1, feat), lambda i, j: (0, 0)),    # alpha: resident
            pl.BlockSpec((1, feat), lambda i, j: (0, 0)),    # beta: resident
            pl.BlockSpec((feat, tn), lambda i, j: (0, j)),   # w: column-tiled
            pl.BlockSpec((1, tn), lambda i, j: (0, j)),      # b: column-tiled
        ],
        out_specs=pl.BlockSpec((tr, tn), lambda i, j: (i, j)),
        scratch_shapes=[pltpu.VMEM((tr, feat), jnp.float32)],  # LayerNorm(x) per row tile
        cost_estimate=cost,
        compiler_params=pltpu.CompilerParams(
            dimension_semantics=("parallel", "arbitrary"),   # rows shard across cores
            vmem_limit_bytes=vmem_limit,
        ),
    )(x2d, alpha2d, beta2d, w, b2d)
    return out2d.reshape(bsz, seq, feat)


# --------------------------------------------------------------------------- #
# Pure-JAX reference
# --------------------------------------------------------------------------- #
def _reference(x, alpha, beta, w, b):
    mean = jnp.mean(x, axis=-1, keepdims=True)
    f = x.shape[-1]
    var = jnp.sum((x - mean) ** 2, axis=-1, keepdims=True) / (f - 1)
    std = jnp.sqrt(var)
    normed = alpha * (x - mean) / (std + EPS) + beta
    sub = normed @ w + b
    return x + sub


if __name__ == "__main__":
    batch, seq, features = 2, 8, 32
    key = jax.random.PRNGKey(0)
    kx, kw, kb = jax.random.split(key, 3)

    x = jax.random.normal(kx, (batch, seq, features), dtype=jnp.float32)

    # LayerNormalization params: init exactly as the PyTorch module does.
    alpha = jnp.ones((features,), dtype=jnp.float32)
    beta = jnp.zeros((features,), dtype=jnp.float32)

    # Deterministic synthetic sublayer (Linear) params, layout (in, out).
    w = jax.random.normal(kw, (features, features), dtype=jnp.float32) * 0.05
    b = jax.random.normal(kb, (features,), dtype=jnp.float32) * 0.05

    out = residual_connection(x, alpha, beta, w, b)
    out = jax.block_until_ready(out)

    ref = _reference(x, alpha, beta, w, b)
    assert out.shape == (batch, seq, features)
    assert jnp.allclose(out, ref, atol=1e-4, rtol=1e-4), "mismatch vs reference"

    print("KERNEL_OK")
</pallas_src>

<mosaic_0001>
module attributes {stable_mosaic.version = 11 : i64} {
  func.func @kernel(%arg0: i32, %arg1: i32, %arg2: memref<16x32xf32, #tpu.memory_space<vmem>>, %arg3: memref<1x32xf32, #tpu.memory_space<vmem>>, %arg4: memref<1x32xf32, #tpu.memory_space<vmem>>, %arg5: memref<32x32xf32, #tpu.memory_space<vmem>>, %arg6: memref<1x32xf32, #tpu.memory_space<vmem>>, %arg7: memref<16x32xf32, #tpu.memory_space<vmem>>, %arg8: memref<16x32xf32, #tpu.memory_space<vmem>>) attributes {dimension_semantics = [#tpu.dimension_semantics<parallel>, #tpu.dimension_semantics<arbitrary>], iteration_bounds = array<i64: 1, 1>, scalar_prefetch = 0 : i64, scratch_operands = 1 : i64, tpu.core_type = #tpu.core_type<tc>, window_params = [{transform_indices = @transform_0, window_bounds = array<i64: 16, 32>}, {pipeline_mode = #tpu.pipeline_mode<synchronous>, transform_indices = @transform_1, window_bounds = array<i64: 1, 32>}, {pipeline_mode = #tpu.pipeline_mode<synchronous>, transform_indices = @transform_2, window_bounds = array<i64: 1, 32>}, {transform_indices = @transform_3, window_bounds = array<i64: 32, 32>}, {transform_indices = @transform_4, window_bounds = array<i64: 1, 32>}, {transform_indices = @transform_5, window_bounds = array<i64: 16, 32>}]} {
    %c0_i32 = arith.constant 0 : i32
    %0 = arith.cmpi eq, %arg1, %c0_i32 : i32
    %1 = arith.extui %0 : i1 to i32
    %c0_i32_0 = arith.constant 0 : i32
    %2 = arith.cmpi ne, %1, %c0_i32_0 : i32
    scf.if %2 {
      %c0_10 = arith.constant 0 : index
      %c0_11 = arith.constant 0 : index
      %12 = vector.load %arg2[%c0_10, %c0_11] : memref<16x32xf32, #tpu.memory_space<vmem>>, vector<16x32xf32>
      %cst_12 = arith.constant dense<0.000000e+00> : vector<16xf32>
      %13 = vector.multi_reduction <add>, %12, %cst_12 [1] : vector<16x32xf32> to vector<16xf32>
      %14 = vector.shape_cast %13 : vector<16xf32> to vector<16x1xf32>
      %cst_13 = arith.constant 3.200000e+01 : f32
      %15 = vector.broadcast %cst_13 : f32 to vector<16x1xf32>
      %16 = arith.divf %14, %15 : vector<16x1xf32>
      %17 = vector.broadcast %16 : vector<16x1xf32> to vector<16x32xf32>
      %18 = arith.subf %12, %17 : vector<16x32xf32>
      %19 = arith.mulf %18, %18 : vector<16x32xf32>
      %cst_14 = arith.constant dense<0.000000e+00> : vector<16xf32>
      %20 = vector.multi_reduction <add>, %19, %cst_14 [1] : vector<16x32xf32> to vector<16xf32>
      %21 = vector.shape_cast %20 : vector<16xf32> to vector<16x1xf32>
      %cst_15 = arith.constant 0.0322580636 : f32
      %22 = vector.broadcast %cst_15 : f32 to vector<16x1xf32>
      %23 = arith.mulf %21, %22 : vector<16x1xf32>
      %24 = math.sqrt %23 : vector<16x1xf32>
      %cst_16 = arith.constant 9.99999997E-7 : f32
      %25 = vector.broadcast %cst_16 : f32 to vector<16x1xf32>
      %26 = arith.addf %24, %25 : vector<16x1xf32>
      %27 = tpu.reciprocal %26 {approx = true} : vector<16x1xf32> -> vector<16x1xf32>
      %28 = arith.mulf %26, %27 : vector<16x1xf32>
      %cst_17 = arith.constant 2.000000e+00 : f32
      %29 = vector.broadcast %cst_17 : f32 to vector<16x1xf32>
      %30 = arith.subf %29, %28 : vector<16x1xf32>
      %31 = arith.mulf %27, %30 : vector<16x1xf32>
      %c0_18 = arith.constant 0 : index
      %c0_19 = arith.constant 0 : index
      %32 = vector.load %arg3[%c0_18, %c0_19] : memref<1x32xf32, #tpu.memory_space<vmem>>, vector<1x32xf32>
      %33 = vector.broadcast %31 : vector<16x1xf32> to vector<16x32xf32>
      %34 = arith.mulf %18, %33 : vector<16x32xf32>
      %35 = vector.broadcast %32 : vector<1x32xf32> to vector<16x32xf32>
      %36 = arith.mulf %35, %34 : vector<16x32xf32>
      %c0_20 = arith.constant 0 : index
      %c0_21 = arith.constant 0 : index
      %37 = vector.load %arg4[%c0_20, %c0_21] : memref<1x32xf32, #tpu.memory_space<vmem>>, vector<1x32xf32>
      %38 = vector.broadcast %37 : vector<1x32xf32> to vector<16x32xf32>
      %39 = arith.addf %36, %38 : vector<16x32xf32>
      %c0_22 = arith.constant 0 : index
      %c0_23 = arith.constant 0 : index
      %40 = vector.load %arg8[%c0_22, %c0_23] : memref<16x32xf32, #tpu.memory_space<vmem>>, vector<16x32xf32>
      tpu.vector_store %arg8[%c0_22, %c0_23], %39 {strides = array<i32>} : memref<16x32xf32, #tpu.memory_space<vmem>>, vector<16x32xf32>,
    } else {
    }
    %c0 = arith.constant 0 : index
    %c0_1 = arith.constant 0 : index
    %3 = vector.load %arg8[%c0, %c0_1] : memref<16x32xf32, #tpu.memory_space<vmem>>, vector<16x32xf32>
    %c0_2 = arith.constant 0 : index
    %c0_3 = arith.constant 0 : index
    %4 = vector.load %arg5[%c0_2, %c0_3] : memref<32x32xf32, #tpu.memory_space<vmem>>, vector<32x32xf32>
    %cst = arith.constant dense<0.000000e+00> : vector<16x32xf32>
    %5 = tpu.matmul %3, %4, %cst {dimension_numbers = #tpu.dot_dimension_numbers<[1], [0], [0], [1], [0, 0, 1, 1], [], []>} : vector<16x32xf32>, vector<32x32xf32>, vector<16x32xf32> -> vector<16x32xf32>
    %c0_4 = arith.constant 0 : index
    %c0_5 = arith.constant 0 : index
    %6 = vector.load %arg6[%c0_4, %c0_5] : memref<1x32xf32, #tpu.memory_space<vmem>>, vector<1x32xf32>
    %7 = vector.broadcast %6 : vector<1x32xf32> to vector<16x32xf32>
    %8 = arith.addf %5, %7 : vector<16x32xf32>
    %c0_6 = arith.constant 0 : index
    %c0_7 = arith.constant 0 : index
    %9 = vector.load %arg2[%c0_6, %c0_7] : memref<16x32xf32, #tpu.memory_space<vmem>>, vector<16x32xf32>
    %10 = arith.addf %9, %8 : vector<16x32xf32>
    %c0_8 = arith.constant 0 : index
    %c0_9 = arith.constant 0 : index
    %11 = vector.load %arg7[%c0_8, %c0_9] : memref<16x32xf32, #tpu.memory_space<vmem>>, vector<16x32xf32>
    tpu.vector_store %arg7[%c0_8, %c0_9], %10 {strides = array<i32>} : memref<16x32xf32, #tpu.memory_space<vmem>>, vector<16x32xf32>,
    return
  }
  func.func @transform_0(%arg0: i32, %arg1: i32) -> (i32, i32) {
    %c0_i32 = arith.constant 0 : i32
    %c0_i32_0 = arith.constant 0 : i32
    return %arg0, %c0_i32 : i32, i32
  }
  func.func @transform_1(%arg0: i32, %arg1: i32) -> (i32, i32) {
    %c0_i32 = arith.constant 0 : i32
    %c0_i32_0 = arith.constant 0 : i32
    %c0_i32_1 = arith.constant 0 : i32
    return %c0_i32, %c0_i32_0 : i32, i32
  }
  func.func @transform_2(%arg0: i32, %arg1: i32) -> (i32, i32) {
    %c0_i32 = arith.constant 0 : i32
    %c0_i32_0 = arith.constant 0 : i32
    %c0_i32_1 = arith.constant 0 : i32
    return %c0_i32, %c0_i32_0 : i32, i32
  }
  func.func @transform_3(%arg0: i32, %arg1: i32) -> (i32, i32) {
    %c0_i32 = arith.constant 0 : i32
    %c0_i32_0 = arith.constant 0 : i32
    return %c0_i32, %arg1 : i32, i32
  }
  func.func @transform_4(%arg0: i32, %arg1: i32) -> (i32, i32) {
    %c0_i32 = arith.constant 0 : i32
    %c0_i32_0 = arith.constant 0 : i32
    return %c0_i32, %arg1 : i32, i32
  }
  func.func @transform_5(%arg0: i32, %arg1: i32) -> (i32, i32) {
    %c0_i32 = arith.constant 0 : i32
    return %arg0, %arg1 : i32, i32
  }
}

</mosaic_0001>

<bundles_post_ra>
// kernel: tpu_custom_call.1
= control target key start
LH: loop header
LB: loop body
LE: loop exit
PB: predicated region body
PF: predicated region fallthrough
CT: control target
= control target key end

     0   :  { %10 = vsyncpa [#allocation4], 0  ;;  %s425_s0 = inlined_call_operand.hbm [shape: f32[16,32], index: 0, kind: input, shape index: {}]   ;;  %s426_s1 = inlined_call_operand.vmem [shape: f32[1,32], index: 1, kind: input, shape index: {}]   ;;  %s427_s2 = inlined_call_operand.vmem [shape: f32[1,32], index: 2, kind: input, shape index: {}]   ;;  %s428_s3 = inlined_call_operand.hbm [shape: f32[32,32], index: 3, kind: input, shape index: {}]   ;;  %s429_s4 = inlined_call_operand.vmem [shape: f32[1,32], index: 4, kind: input, shape index: {}]   ;;  %s430_s5 = inlined_call_operand.hbm [shape: f32[16,32], index: 5, kind: output, shape index: {}]  }
   0x1   :  { %11 = vsyncpa [#allocation7], 0 }
   0x2   :  { %12 = vsyncpa [#allocation5], 0  ;;  %s343_s18 = smov [#allocation3]  }
   0x3   :  { %s18_s19 = sshll.u32 %s343_s18, 4  ;;  %s19_s19 = int_to_ptr.vmem [resolvable:$true] %s18_s19 }
   0x4   :  { %s285_s20 = scalar_lea.vmem %s19_s19, 256  ;;  %p290_p1 = scmp.lt.s32.totalorder %s19_s19, %s19_s19 }
   0x5   :  { %p286_p0 = scmp.ne.s32.totalorder %s19_s19, %s285_s20  ;;  %p291_p2 = scmp.lt.s32.totalorder %s285_s20, %s285_s20 }
   0x7   :  { %p292_p3 = por %p291_p2, %p290_p1 }
   0x9   :  { %p293_p4 = pnand %p292_p3, %p286_p0 }
   0xb   :  { %296 = shalt.err (!%p293_p4)
}
   0xc   :  { %s344_s21 = smov 128   ;;  %s345_s22 = smov 8  }
   0xd   :  { %24 = dma.hbm_to_vmem [thread:$0]  %s425_s0, 256, %s19_s19, [#allocation4], %s344_s21, %s344_s21, %s345_s22  }
   0xe   :  { %s346_s25 = smov [#allocation6]  }
   0xf   :  { %s34_s26 = sshll.u32 %s346_s25, 4  ;;  %s35_s26 = int_to_ptr.vmem [resolvable:$true] %s34_s26 }
  0x10   :  { %s305_s27 = scalar_lea.vmem %s35_s26, 512  ;;  %p310_p6 = scmp.lt.s32.totalorder %s35_s26, %s35_s26 }
  0x11   :  { %p306_p5 = scmp.ne.s32.totalorder %s35_s26, %s305_s27  ;;  %p311_p7 = scmp.lt.s32.totalorder %s305_s27, %s305_s27 }
  0x13   :  { %p312_p8 = por %p311_p7, %p310_p6 }
  0x15   :  { %p313_p9 = pnand %p312_p8, %p306_p5 }
  0x17   :  { %316 = shalt.err (!%p313_p9)
}
  0x18   :  { %40 = dma.hbm_to_vmem [thread:$0]  %s428_s3, 512, %s35_s26, [#allocation7], %s344_s21, %s344_s21, %s345_s22  }
  0x19   :  { %337 = dma.done.wait [#allocation4], 256  }
  0x1a   :  { %338 = vsyncadd [#allocation4], 4294967040 }
  0x1b   :  { %339 = dma.done.wait [#allocation7], 512  }
  0x1c   :  { %340 = vsyncadd [#allocation7], 4294966784  ;;  %vm55_vm0 = vcmask 261120   ;;  %v390_v0 = vld [vmem:[#allocation3] sm:$0xff]  ;;  %v392_v1 = vld [vmem:[#allocation3 + $0x8] sm:$0xff] }
  0x1d   :  { %v56_v2 = vsel %vm55_vm0, %v390_v0, 0.0  ;;  %v59_v3 = vsel %vm55_vm0, %v392_v1, 0.0  ;;  %v128_v14 = vld [vmem:[#allocation6 + $0x18] sm:$0xff]  ;;  %v127_v15 = vld [vmem:[#allocation6 + $0x10] sm:$0xff]  ;;  %v126_v16 = vld [vmem:[#allocation6 + $0x8] sm:$0xff] }
  0x1e   :  { %57 = vadd.xlane.f32.xlu0 %v56_v2  ;;  %253 = vmatprep.subr.mxu0 %v128_v14  ;;  %v125_v17 = vld [vmem:[#allocation6] sm:$0xff] }
  0x1f   :  { %254 = vmatpush3.msra.mxu0 %v128_v14  ;;  %v242_v40 = vld [vmem:[%s426_s1] ss:$0 sm:$0xff] }
  0x20   :  { %255 = vmatprep.subr.mxu0 %v127_v15  ;;  %v243_v43 = vld [vmem:[%s427_s2] ss:$0 sm:$0xff]  ;;  %s347_s2 = smov [#allocation8]  }
  0x21   :  { %256 = vmatpush3.msra.mxu0 %v127_v15  ;;  %v244_v52 = vld [vmem:[%s429_s4] ss:$0 sm:$0xff]  ;;  %s229_s8 = sshll.u32 %s347_s2, 4  ;;  %s230_s8 = int_to_ptr.vmem [resolvable:$true] %s229_s8 }
  0x22   :  { %60 = vadd.xlane.f32.xlu0 %v59_v3  ;;  %257 = vmatprep.subr.mxu0 %v126_v16  ;;  %s317_s9 = scalar_lea.vmem %s230_s8, 256  ;;  %p322_p11 = scmp.lt.s32.totalorder %s230_s8, %s230_s8 }
  0x23   :  { %258 = vmatpush3.msra.mxu0 %v126_v16  ;;  %p318_p10 = scmp.ne.s32.totalorder %s230_s8, %s317_s9  ;;  %p323_p12 = scmp.lt.s32.totalorder %s317_s9, %s317_s9 }
  0x24   :  { %259 = vmatprep.subr.mxu0 %v125_v17 }
  0x25   :  { %260 = vmatpush3.msra.mxu0 %v125_v17  ;;  %p324_p13 = por %p323_p12, %p322_p11 }
  0x27   :  { %p325_p0 = pnand %p324_p13, %p318_p10 }
  0xa7   :  { %v58_v4 = vpop.xlane.xlu0 %57 }
  0xa8   :  { %v63_v5 = vmul.f32 0.03125, %v58_v4 }
  0xaa   :  { %v65_v6 = vsub.f32 %v390_v0, %v63_v5 }
  0xab   :  { %v61_v7 = vpop.xlane.xlu0 %60 }
  0xac   :  { %v64_v8 = vmul.f32 0.03125, %v61_v7  ;;  %v67_v9 = vmul.f32 %v65_v6, %v65_v6 }
  0xae   :  { %v66_v10 = vsub.f32 %v392_v1, %v64_v8  ;;  %v69_v11 = vsel %vm55_vm0, %v67_v9, 0.0 }
  0xaf   :  { %70 = vadd.xlane.f32.xlu1 %v69_v11 }
  0xb0   :  { %v68_v12 = vmul.f32 %v66_v10, %v66_v10 }
  0xb2   :  { %v72_v13 = vsel %vm55_vm0, %v68_v12, 0.0 }
  0xb3   :  { %73 = vadd.xlane.f32.xlu1 %v72_v13 }
 0x138   :  { %v71_v18 = vpop.xlane.xlu1 %70 }
 0x139   :  { %v75_v19 = vmul.f32 0.032258064, %v71_v18 }
 0x13b   :  { %269 = vrsqrt.f32 %v75_v19  ;;  %vm79_vm1 = vcmp.eq.f32.partialorder %v75_v19, inf  ;;  %v82_v24 = vand.u32 2147483648, %v75_v19  ;;  %vm81_vm2 = vcmp.eq.f32.partialorder %v75_v19, 0.0 }
 0x13c   :  { %v74_v20 = vpop.xlane.xlu1 %73 }
 0x13d   :  { %v76_v21 = vmul.f32 0.032258064, %v74_v20 }
 0x13f   :  { %271 = vrsqrt.f32 %v76_v21  ;;  %vm86_vm3 = vcmp.eq.f32.partialorder %v76_v21, inf  ;;  %v89_v30 = vand.u32 2147483648, %v76_v21  ;;  %vm88_vm4 = vcmp.eq.f32.partialorder %v76_v21, 0.0 }
 0x148   :  { %v270_v22 = vpop.eup %269 }
 0x149   :  { %v78_v23 = vmul.f32 %v270_v22, %v75_v19 }
 0x14b   :  { %v80_v25 = vsel %vm79_vm1, %v75_v19, %v78_v23 }
 0x14c   :  { %v272_v26 = vpop.eup %271  ;;  %v83_v27 = vsel %vm81_vm2, %v82_v24, %v80_v25 }
 0x14d   :  { %v91_v28 = vadd.f32 1e-06, %v83_v27  ;;  %v85_v29 = vmul.f32 %v272_v26, %v76_v21 }
 0x14f   :  { %273 = vrcp.f32 %v91_v28  ;;  %v87_v31 = vsel %vm86_vm3, %v76_v21, %v85_v29 }
 0x150   :  { %v90_v32 = vsel %vm88_vm4, %v89_v30, %v87_v31 }
 0x151   :  { %v92_v33 = vadd.f32 1e-06, %v90_v32 }
 0x153   :  { %275 = vrcp.f32 %v92_v33 }
 0x15c   :  { %v274_v34 = vpop.eup %273 }
 0x15d   :  { %v95_v35 = vmul.f32 %v274_v34, %v91_v28 }
 0x15f   :  { %v97_v36 = vsub.f32 2.0, %v95_v35 }
 0x160   :  { %v276_v37 = vpop.eup %275 }
 0x161   :  { %v99_v38 = vmul.f32 %v274_v34, %v97_v36  ;;  %v96_v39 = vmul.f32 %v276_v37, %v92_v33 }
 0x163   :  { %v102_v41 = vmul.f32 %v99_v38, %v65_v6  ;;  %v98_v42 = vsub.f32 2.0, %v96_v39 }
 0x165   :  { %v110_v44 = vmul.f32 %v242_v40, %v102_v41  ;;  %v100_v45 = vmul.f32 %v276_v37, %v98_v42 }
 0x167   :  { %v119_v46 = vadd.f32 %v243_v43, %v110_v44  ;;  %v103_v47 = vmul.f32 %v100_v45, %v66_v10 }
 0x169   :  { %121 = vst.msk [vmem:[#allocation2] sm:$0xff] %vm55_vm0, %v119_v46  ;;  %v111_v48 = vmul.f32 %v242_v40, %v103_v47 }
 0x16b   :  { %v120_v49 = vadd.f32 %v243_v43, %v111_v48 }
 0x16d   :  { %122 = vst.msk [vmem:[#allocation2 + $0x8] sm:$0xff] %vm55_vm0, %v120_v49 }
 0x170   :  { %v123_v50 = vld [vmem:[#allocation2] sm:$0xff] }
 0x171   :  { %261 = vmatprep.mubr.msk.f32.mxu0 %vm55_vm0, %v123_v50 }
 0x174   :  { %v124_v51 = vld [vmem:[#allocation2 + $0x8] sm:$0xff] }
 0x175   :  { %262 = vmatmul.mubr.msk.f32.vlgmr.msra.gmra.mxu0 %vm55_vm0, %v124_v51 }
 0x235   :  { %v263_v53 = vpop.f32.mrf.mxu0 }
 0x236   :  { %v215_v54 = vadd.f32 %v263_v53, %v244_v52 }
 0x237   :  { %v209_v55 = vpop.f32.mrf.mxu0 }
 0x238   :  { %v221_v56 = vadd.f32 %v215_v54, %v392_v1  ;;  %v210_v57 = vadd.f32 %v244_v52, %v209_v55 }
 0x23a   :  { %223 = vst.msk [vmem:[#allocation8 + $0x8] sm:$0xff] %vm55_vm0, %v221_v56  ;;  %v220_v58 = vadd.f32 %v210_v57, %v390_v0 }
 0x23c   :  { %222 = vst.msk [vmem:[#allocation8] sm:$0xff] %vm55_vm0, %v220_v58 }
 0x23d   :  { %328 = shalt.err (!%p325_p0)
}
 0x23e   :  { %235 = dma.vmem_to_hbm [thread:$0]  %s230_s8, 256, %s430_s5, [#allocation5], %s344_s21, %s344_s21, %s345_s22  }
 0x23f   :  { %341 = dma.done.wait [#allocation5], 256  }
 0x240   :  { %342 = vsyncadd [#allocation5], 4294967040 }
 0x241   :  { %239 = vsyncpa [#allocation4], 1 }
 0x242   :  { %240 = vsyncpa [#allocation7], 1 }
 0x243   :  { %241 = vsyncpa [#allocation5], 1 }

</bundles_post_ra>
